<compile_context>
chip_gen: v7x
topology: tpu7x:2x2x1
jax: 0.10.0
libtpu: 0.0.40
codegen_flags: <defaults>
</compile_context>

<pallas_src>
import functools
from dataclasses import dataclass
from typing import Optional

import jax
import jax.numpy as jnp
from jax.experimental import pallas as pl
from jax.experimental.pallas import tpu as pltpu


@dataclass
class mArgs:
    dim: int = 512
    nLayers: int = 3
    nHeads: int = 32
    nKVHeads: Optional[int] = None
    VocabSize: int = 30080
    MultipleOf: int = 256
    FFNDIMMULTIPLIER: Optional[float] = None
    NormEps: float = 1e-05
    MaxBatchSize: int = 64
    MaxSeqLen: int = 128


def compute_hidden_dim(args: mArgs) -> int:
    HiddenDim = 4 * args.dim
    _ = int(2 * HiddenDim / 3)  # dead assignment in the original (typo'd variable name)
    if args.FFNDIMMULTIPLIER is not None:
        HiddenDim = int(args.FFNDIMMULTIPLIER * HiddenDim)
    HiddenDim = args.MultipleOf * ((HiddenDim + args.MultipleOf - 1) // args.MultipleOf)
    return HiddenDim


def _round_up(a: int, b: int) -> int:
    return (a + b - 1) // b * b


def _vmem_capacity_bytes() -> int:
    try:
        info = pltpu.get_tpu_info()
        for name in ("vmem_capacity_bytes", "vmem_bytes", "vmem_size_bytes"):
            v = getattr(info, name, None)
            if v:
                return int(v)
    except Exception:
        pass
    return 128 * 1024 * 1024  # v5e/v6e default


# ----------------------------- kernels --------------------------------------


def _silu(h1, approx_sigmoid):
    if approx_sigmoid:
        # exp on the EUP, approximate reciprocal on the EUP (free slot next to MXU/VPU)
        sig = pl.reciprocal(1.0 + jnp.exp(-h1), approx=True)
    else:
        sig = jax.nn.sigmoid(h1)
    return h1 * sig


def _ffn_kernel_noacc(x_ref, w13_ref, w2_ref, o_ref, *, th, approx_sigmoid):
    # Full hidden dim resident: single pass, no accumulator scratch.
    x = x_ref[...]
    h13 = jnp.dot(x, w13_ref[...], preferred_element_type=jnp.float32)
    # Exact module semantics: silu(w1 x) + w3 x  (ADD, not the usual SwiGLU multiply).
    h = _silu(h13[:, :th], approx_sigmoid) + h13[:, th:]
    o_ref[...] = jnp.dot(h.astype(w2_ref.dtype), w2_ref[...],
                         preferred_element_type=jnp.float32).astype(o_ref.dtype)


def _ffn_kernel_acc(x_ref, w13_ref, w2_ref, o_ref, acc_ref, *, th, approx_sigmoid):
    # Hidden axis tiled (reduction axis, last in grid): accumulate into f32 scratch.
    j = pl.program_id(1)

    @pl.when(j == 0)
    def _init():
        acc_ref[...] = jnp.zeros_like(acc_ref)

    x = x_ref[...]
    h13 = jnp.dot(x, w13_ref[...], preferred_element_type=jnp.float32)
    h = _silu(h13[:, :th], approx_sigmoid) + h13[:, th:]
    acc_ref[...] += jnp.dot(h.astype(w2_ref.dtype), w2_ref[...],
                            preferred_element_type=jnp.float32)

    @pl.when(j == pl.num_programs(1) - 1)
    def _finalize():
        o_ref[...] = acc_ref[...].astype(o_ref.dtype)


# ----------------------------- wrapper ---------------------------------------


def make_feedforward(w1t, w3t, w2t, *, matmul_dtype=jnp.bfloat16, out_dtype=None,
                     tm=None, th=None, approx_sigmoid=True, allow_deep_buffering=True):
    """Pre-processes weights once (cast + pad + w1/w3 fusion) and returns apply(x).

    w1t, w3t: [dim, hidden] (transposed nn.Linear weights); w2t: [hidden, dim].
    """
    D, H = w1t.shape
    assert w3t.shape == (D, H), "w3 shape mismatch"
    assert w2t.shape == (H, D), "w2 shape mismatch"

    matmul_dtype = jnp.dtype(matmul_dtype)
    itemsize = matmul_dtype.itemsize
    sub = 16 if itemsize == 2 else 8
    budget = (_vmem_capacity_bytes() * 3) // 4  # 25% headroom: ~48 MiB v7x, ~96 MiB v5e/v6e

    # ---- token-tile target (effective tm per call is min(this, round_up(M))) ----
    tm_plan = tm if tm is not None else (1024 if itemsize <= 2 else 512)
    tm_plan = max(sub, _round_up(tm_plan, sub))

    # ---- hidden tile: 256-aligned, prefer full weight residency when it fits ----
    align = 256 if H >= 256 else 128
    Hpad_full = _round_up(H, align)

    def vmem_use(tm_, th_, n_h, nbuf_w):
        acc = tm_ * D * 4 if n_h > 1 else 0
        return (2 * tm_ * D * itemsize                       # x tile (double-buffered)
                + nbuf_w * 3 * D * th_ * itemsize            # w13 (2*th) + w2 (th) tiles
                + 2 * tm_ * D * 4                            # output tile (f32 worst case)
                + acc                                        # f32 accumulator scratch
                + tm_ * th_ * (3 * 4 + itemsize))            # h13/h f32 + cast of h

    if th is None:
        while True:
            th = Hpad_full
            while th > align and vmem_use(tm_plan, th, pl.cdiv(Hpad_full, th), 2) > budget:
                th -= align
            if vmem_use(tm_plan, th, pl.cdiv(Hpad_full, th), 2) <= budget or tm_plan <= sub:
                break
            tm_plan = max(sub, _round_up(tm_plan // 2, sub))
    th = max(128, _round_up(th, 128))
    th = min(th, _round_up(Hpad_full, 128))
    Hpad = _round_up(Hpad_full, th)
    n_h = Hpad // th

    # ---- weight prep done ONCE (not per call): cast, zero-pad hidden, fuse w1||w3 ----
    w1p = w1t.astype(matmul_dtype)
    w3p = w3t.astype(matmul_dtype)
    w2p = w2t.astype(matmul_dtype)
    if Hpad != H:
        # Zero-padded hidden columns/rows contribute exactly zero to the output.
        w1p = jnp.pad(w1p, ((0, 0), (0, Hpad - H)))
        w3p = jnp.pad(w3p, ((0, 0), (0, Hpad - H)))
        w2p = jnp.pad(w2p, ((0, Hpad - H), (0, 0)))
    # Interleave per hidden tile so block j of width 2*th == [w1 tile j | w3 tile j].
    w13 = jnp.concatenate(
        [w1p.reshape(D, n_h, 1, th), w3p.reshape(D, n_h, 1, th)], axis=2
    ).reshape(D, 2 * Hpad)

    def apply(x):
        B, S, Dx = x.shape
        assert Dx == D, "input feature dim mismatch"
        odt = out_dtype if out_dtype is not None else x.dtype
        out_itemsize = jnp.dtype(odt).itemsize
        M = B * S

        tm_eff = max(sub, min(tm_plan, _round_up(M, sub)))
        # v7x megacore: prefer >=2 token tiles on the parallel axis when there is work.
        if M >= 512 and _round_up(M, tm_eff) // tm_eff < 2:
            tm_eff = max(sub, _round_up(pl.cdiv(M, 2), sub))
        Mp = _round_up(M, tm_eff)
        n_m = Mp // tm_eff

        x2d = x.reshape(M, D).astype(matmul_dtype)
        if Mp != M:
            # Zero padding is exact: silu(0) + 0 = 0 and 0 @ w2 = 0; rows sliced off below.
            x2d = jnp.pad(x2d, ((0, Mp - M), (0, 0)))

        use_buf3 = (allow_deep_buffering and tm_eff <= 128 and n_h >= 3
                    and vmem_use(tm_eff, th, n_h, 3) <= budget)
        w_pipe = dict(pipeline_mode=pl.Buffered(3)) if use_buf3 else {}

        est = vmem_use(tm_eff, th, n_h, 3 if use_buf3 else 2)
        vmem_limit = int(min(budget, max(32 * 1024 * 1024, est * 3 // 2)))

        cost = pl.CostEstimate(
            flops=6 * Mp * D * Hpad,                       # three matmuls of 2*M*D*H
            transcendentals=Mp * Hpad,                     # sigmoid
            bytes_accessed=(Mp * D * itemsize
                            + n_m * 3 * D * Hpad * itemsize  # weights re-streamed per token tile
                            + Mp * D * out_itemsize),
        )
        cparams = pltpu.CompilerParams(
            dimension_semantics=("parallel",) if n_h == 1 else ("parallel", "arbitrary"),
            vmem_limit_bytes=vmem_limit,
        )

        if n_h == 1:
            kernel = functools.partial(_ffn_kernel_noacc, th=th,
                                       approx_sigmoid=approx_sigmoid)
            out2d = pl.pallas_call(
                kernel,
                out_shape=jax.ShapeDtypeStruct((Mp, D), odt),
                grid=(n_m,),
                in_specs=[
                    pl.BlockSpec((tm_eff, D), lambda i: (i, 0)),    # token tile
                    pl.BlockSpec((D, 2 * th), lambda i: (0, 0)),    # fused w1||w3 (resident)
                    pl.BlockSpec((th, D), lambda i: (0, 0)),        # w2^T (resident)
                ],
                out_specs=pl.BlockSpec((tm_eff, D), lambda i: (i, 0)),
                compiler_params=cparams,
                cost_estimate=cost,
            )(x2d, w13, w2p)
        else:
            kernel = functools.partial(_ffn_kernel_acc, th=th,
                                       approx_sigmoid=approx_sigmoid)
            out2d = pl.pallas_call(
                kernel,
                out_shape=jax.ShapeDtypeStruct((Mp, D), odt),
                grid=(n_m, n_h),
                in_specs=[
                    pl.BlockSpec((tm_eff, D), lambda i, j: (i, 0)),            # token tile
                    pl.BlockSpec((D, 2 * th), lambda i, j: (0, j), **w_pipe),  # w1||w3 slice
                    pl.BlockSpec((th, D), lambda i, j: (j, 0), **w_pipe),      # w2^T slice
                ],
                out_specs=pl.BlockSpec((tm_eff, D), lambda i, j: (i, 0)),
                scratch_shapes=[pltpu.VMEM((tm_eff, D), jnp.float32)],
                compiler_params=cparams,
                cost_estimate=cost,
            )(x2d, w13, w2p)

        return out2d[:M].reshape(B, S, D)

    return apply


def feedforward_pallas(x, w1t, w3t, w2t, **kwargs):
    """Convenience one-shot wrapper (weight prep happens inside; prefer make_feedforward)."""
    return make_feedforward(w1t, w3t, w2t, **kwargs)(x)


def reference_jax(x2d, w1t, w3t, w2t):
    h1 = x2d @ w1t
    h = h1 * jax.nn.sigmoid(h1) + x2d @ w3t
    return h @ w2t


if __name__ == "__main__":
    key = jax.random.PRNGKey(0)

    def make_inputs(k, D, H, B=2, S=8):
        kx, k1, k2, k3 = jax.random.split(k, 4)
        x = jax.random.normal(kx, (B, S, D), dtype=jnp.float32)
        s1 = 1.0 / jnp.sqrt(D)
        s2 = 1.0 / jnp.sqrt(H)
        w1t = jax.random.uniform(k1, (D, H), jnp.float32, -1.0, 1.0) * s1
        w3t = jax.random.uniform(k3, (D, H), jnp.float32, -1.0, 1.0) * s1
        w2t = jax.random.uniform(k2, (H, D), jnp.float32, -1.0, 1.0) * s2
        return x, w1t, w3t, w2t

    k0, k1c, k2c = jax.random.split(key, 3)

    # --- case 1: module-consistent small config (dim=32, MultipleOf=16 -> hidden=128),
    #             full weight residency, no-accumulator kernel path ---
    args = mArgs(dim=32, MultipleOf=16)
    H = compute_hidden_dim(args)
    x, w1t, w3t, w2t = make_inputs(k0, args.dim, H)
    ref = reference_jax(x.reshape(-1, args.dim), w1t, w3t, w2t).reshape(x.shape)

    # exact f32 path: tight check of tiling / w1||w3 fusion
    out_f32 = feedforward_pallas(x, w1t, w3t, w2t,
                                 matmul_dtype=jnp.float32, approx_sigmoid=False)
    jax.block_until_ready(out_f32)
    assert out_f32.shape == x.shape
    assert jnp.allclose(out_f32, ref, atol=1e-4, rtol=1e-4), "f32 kernel mismatch"

    # default fast path: bf16 matmuls, f32 accumulation, EUP sigmoid
    out_bf16 = feedforward_pallas(x, w1t, w3t, w2t)
    jax.block_until_ready(out_bf16)
    assert jnp.allclose(out_bf16, ref, atol=8e-2, rtol=8e-2), "bf16 kernel mismatch"

    # --- case 2: multiple hidden tiles -> accumulator over the reduction axis ---
    args2 = mArgs(dim=128, MultipleOf=256)
    H2 = compute_hidden_dim(args2)  # 512
    x2, w1t2, w3t2, w2t2 = make_inputs(k1c, args2.dim, H2)
    ref2 = reference_jax(x2.reshape(-1, args2.dim), w1t2, w3t2, w2t2).reshape(x2.shape)
    out2 = feedforward_pallas(x2, w1t2, w3t2, w2t2, th=256,
                              matmul_dtype=jnp.float32, approx_sigmoid=False)
    jax.block_until_ready(out2)
    assert jnp.allclose(out2, ref2, atol=1e-4, rtol=1e-4), "acc-path kernel mismatch"

    # --- case 3: decode-like small M with >=3 hidden tiles -> Buffered(3) weight path ---
    args3 = mArgs(dim=256, MultipleOf=256)
    H3 = compute_hidden_dim(args3)  # 1024
    x3, w1t3, w3t3, w2t3 = make_inputs(k2c, args3.dim, H3)
    ref3 = reference_jax(x3.reshape(-1, args3.dim), w1t3, w3t3, w2t3).reshape(x3.shape)
    out3 = feedforward_pallas(x3, w1t3, w3t3, w2t3, th=256)  # bf16 default, 4 hidden tiles
    jax.block_until_ready(out3)
    assert jnp.allclose(out3, ref3, atol=1e-1, rtol=1e-1), "buffered-path kernel mismatch"

    print("KERNEL_OK")
</pallas_src>

<mosaic_0001>
module attributes {stable_mosaic.version = 11 : i64} {
  func.func @_ffn_kernel_noacc(%arg0: i32, %arg1: memref<16x32xf32, #tpu.memory_space<vmem>>, %arg2: memref<32x256xf32, #tpu.memory_space<vmem>>, %arg3: memref<128x32xf32, #tpu.memory_space<vmem>>, %arg4: memref<16x32xf32, #tpu.memory_space<vmem>>) attributes {dimension_semantics = [#tpu.dimension_semantics<parallel>], iteration_bounds = array<i64: 1>, scalar_prefetch = 0 : i64, scratch_operands = 0 : i64, tpu.core_type = #tpu.core_type<tc>, window_params = [{transform_indices = @transform_0, window_bounds = array<i64: 16, 32>}, {pipeline_mode = #tpu.pipeline_mode<synchronous>, transform_indices = @transform_1, window_bounds = array<i64: 32, 256>}, {pipeline_mode = #tpu.pipeline_mode<synchronous>, transform_indices = @transform_2, window_bounds = array<i64: 128, 32>}, {transform_indices = @transform_3, window_bounds = array<i64: 16, 32>}]} {
    %c0 = arith.constant 0 : index
    %c0_0 = arith.constant 0 : index
    %0 = vector.load %arg1[%c0, %c0_0] : memref<16x32xf32, #tpu.memory_space<vmem>>, vector<16x32xf32>
    %c0_1 = arith.constant 0 : index
    %c0_2 = arith.constant 0 : index
    %1 = vector.load %arg2[%c0_1, %c0_2] : memref<32x256xf32, #tpu.memory_space<vmem>>, vector<32x256xf32>
    %cst = arith.constant dense<0.000000e+00> : vector<16x256xf32>
    %2 = tpu.matmul %0, %1, %cst {dimension_numbers = #tpu.dot_dimension_numbers<[1], [0], [0], [1], [0, 0, 1, 1], [], []>} : vector<16x32xf32>, vector<32x256xf32>, vector<16x256xf32> -> vector<16x256xf32>
    %3 = vector.extract_strided_slice %2 {offsets = [0, 0], sizes = [16, 128], strides = [1, 1]} : vector<16x256xf32> to vector<16x128xf32>
    %4 = arith.negf %3 : vector<16x128xf32>
    %5 = math.exp %4 : vector<16x128xf32>
    %cst_3 = arith.constant 1.000000e+00 : f32
    %6 = vector.broadcast %cst_3 : f32 to vector<16x128xf32>
    %7 = arith.addf %6, %5 : vector<16x128xf32>
    %8 = arith.divf %6, %7 : vector<16x128xf32>
    %9 = arith.mulf %3, %8 : vector<16x128xf32>
    %10 = vector.extract_strided_slice %2 {offsets = [0, 128], sizes = [16, 128], strides = [1, 1]} : vector<16x256xf32> to vector<16x128xf32>
    %11 = arith.addf %9, %10 : vector<16x128xf32>
    %c0_4 = arith.constant 0 : index
    %c0_5 = arith.constant 0 : index
    %12 = vector.load %arg3[%c0_4, %c0_5] : memref<128x32xf32, #tpu.memory_space<vmem>>, vector<128x32xf32>
    %cst_6 = arith.constant dense<0.000000e+00> : vector<16x32xf32>
    %13 = tpu.matmul %11, %12, %cst_6 {dimension_numbers = #tpu.dot_dimension_numbers<[1], [0], [0], [1], [0, 0, 1, 1], [], []>} : vector<16x128xf32>, vector<128x32xf32>, vector<16x32xf32> -> vector<16x32xf32>
    %c0_7 = arith.constant 0 : index
    %c0_8 = arith.constant 0 : index
    %14 = vector.load %arg4[%c0_7, %c0_8] : memref<16x32xf32, #tpu.memory_space<vmem>>, vector<16x32xf32>
    tpu.vector_store %arg4[%c0_7, %c0_8], %13 {strides = array<i32>} : memref<16x32xf32, #tpu.memory_space<vmem>>, vector<16x32xf32>,
    return
  }
  func.func @transform_0(%arg0: i32) -> (i32, i32) {
    %c0_i32 = arith.constant 0 : i32
    %c0_i32_0 = arith.constant 0 : i32
    return %arg0, %c0_i32 : i32, i32
  }
  func.func @transform_1(%arg0: i32) -> (i32, i32) {
    %c0_i32 = arith.constant 0 : i32
    %c0_i32_0 = arith.constant 0 : i32
    %c0_i32_1 = arith.constant 0 : i32
    return %c0_i32, %c0_i32_0 : i32, i32
  }
  func.func @transform_2(%arg0: i32) -> (i32, i32) {
    %c0_i32 = arith.constant 0 : i32
    %c0_i32_0 = arith.constant 0 : i32
    %c0_i32_1 = arith.constant 0 : i32
    return %c0_i32, %c0_i32_0 : i32, i32
  }
  func.func @transform_3(%arg0: i32) -> (i32, i32) {
    %c0_i32 = arith.constant 0 : i32
    %c0_i32_0 = arith.constant 0 : i32
    return %arg0, %c0_i32 : i32, i32
  }
}

</mosaic_0001>

<bundles_post_ra>
// kernel: tpu_custom_call.1
= control target key start
LH: loop header
LB: loop body
LE: loop exit
PB: predicated region body
PF: predicated region fallthrough
CT: control target
= control target key end

     0   :  { %v367_v7 = vmov 0.0   ;;  %s485_s0 = inlined_call_operand.vmem [shape: f32[16,32], index: 0, kind: input, shape index: {}]   ;;  %s486_s1 = inlined_call_operand.vmem [shape: f32[32,256], index: 1, kind: input, shape index: {}]   ;;  %s487_s2 = inlined_call_operand.vmem [shape: f32[128,32], index: 2, kind: input, shape index: {}]   ;;  %s488_s3 = inlined_call_operand.hbm [shape: f32[16,32], index: 3, kind: output, shape index: {}]  }
   0x1   :  { %v18_v0 = vld [vmem:[%s486_s1 + $0x8] sm:$0xff]  ;;  %v20_v1 = vld [vmem:[%s486_s1 + $0x18] sm:$0xff]  ;;  %v17_v2 = vld [vmem:[%s486_s1] sm:$0xff]  ;;  %96 = vmatprep.mubr.f32.mxu0 %v367_v7 }
   0x2   :  { %v291_v3 = vpack.c.bf16 %v20_v1, %v18_v0  ;;  %v19_v4 = vld [vmem:[%s486_s1 + $0x10] sm:$0xff]  ;;  %v22_v5 = vld [vmem:[%s486_s1 + $0x28] sm:$0xff]  ;;  %v24_v6 = vld [vmem:[%s486_s1 + $0x38] sm:$0xff] }
   0x3   :  { %v293_v8 = vpack.c.bf16 %v19_v4, %v17_v2  ;;  %v295_v9 = vpack.c.bf16 %v24_v6, %v22_v5  ;;  %v21_v10 = vld [vmem:[%s486_s1 + $0x20] sm:$0xff]  ;;  %v23_v11 = vld [vmem:[%s486_s1 + $0x30] sm:$0xff] }
   0x4   :  { %292 = vmatprep.subr.bf16.mxu0 %v291_v3 }
   0x5   :  { %8 = vsyncpa [#allocation3], 0  ;;  %294 = vmatpush1.bf16.msra.mxu0 %v293_v8  ;;  %v297_v12 = vpack.c.bf16 %v23_v11, %v21_v10  ;;  %v15_v13 = vld [vmem:[%s485_s0] sm:$0xff]  ;;  %vm25_vm0 = vcmask 261120   ;;  %v16_v14 = vld [vmem:[%s485_s0 + $0x8] sm:$0xff] }
   0x6   :  { %296 = vmatprep.subr.bf16.mxu0 %v295_v9  ;;  %v125_v15 = vld [vmem:[%s487_s2] sm:$0xff]  ;;  %v126_v16 = vld [vmem:[%s487_s2 + $0x8] sm:$0xff]  ;;  %v127_v18 = vld [vmem:[%s487_s2 + $0x10] sm:$0xff] }
   0x7   :  { %v299_v17 = vpack.c.bf16 %v126_v16, %v125_v15  ;;  %v128_v19 = vld [vmem:[%s487_s2 + $0x18] sm:$0xff]  ;;  %v129_v21 = vld [vmem:[%s487_s2 + $0x20] sm:$0xff]  ;;  %v130_v22 = vld [vmem:[%s487_s2 + $0x28] sm:$0xff] }
   0x8   :  { %v303_v20 = vpack.c.bf16 %v128_v19, %v127_v18  ;;  %v307_v23 = vpack.c.bf16 %v130_v22, %v129_v21  ;;  %v131_v24 = vld [vmem:[%s487_s2 + $0x30] sm:$0xff]  ;;  %v132_v25 = vld [vmem:[%s487_s2 + $0x38] sm:$0xff]  ;;  %v133_v27 = vld [vmem:[%s487_s2 + $0x40] sm:$0xff] }
   0x9   :  { %298 = vmatpush1.bf16.msra.mxu0 %v297_v12  ;;  %300 = vmatprep.subr.bf16.mxu1 %v299_v17  ;;  %v311_v26 = vpack.c.bf16 %v132_v25, %v131_v24  ;;  %v134_v28 = vld [vmem:[%s487_s2 + $0x48] sm:$0xff]  ;;  %v135_v30 = vld [vmem:[%s487_s2 + $0x50] sm:$0xff]  ;;  %v136_v31 = vld [vmem:[%s487_s2 + $0x58] sm:$0xff] }
   0xa   :  { %302 = vmatpush3.bf16.msra.mxu1 %v299_v17  ;;  %v315_v29 = vpack.c.bf16 %v134_v28, %v133_v27  ;;  %v319_v32 = vpack.c.bf16 %v136_v31, %v135_v30  ;;  %v137_v33 = vld [vmem:[%s487_s2 + $0x60] sm:$0xff]  ;;  %v138_v34 = vld [vmem:[%s487_s2 + $0x68] sm:$0xff]  ;;  %v139_v36 = vld [vmem:[%s487_s2 + $0x70] sm:$0xff] }
   0xb   :  { %304 = vmatprep.subr.bf16.mxu1 %v303_v20  ;;  %v323_v35 = vpack.c.bf16 %v138_v34, %v137_v33  ;;  %v140_v37 = vld [vmem:[%s487_s2 + $0x78] sm:$0xff]  ;;  %s368_s2 = smov [#allocation2]  }
   0xc   :  { %234 = vmatmul.mubr.msk.f32.vlgmr.msra.gmra.mrb[0].mxu0 %vm25_vm0, %v15_v13  ;;  %v327_v38 = vpack.c.bf16 %v140_v37, %v139_v36  ;;  %s223_s7 = sshll.u32 %s368_s2, 4  ;;  %s224_s7 = int_to_ptr.vmem [resolvable:$true] %s223_s7 }
   0xd   :  { %102 = vmatprep.mubr.f32.mxu0 %v367_v7  ;;  %s343_s8 = scalar_lea.vmem %s224_s7, 256  ;;  %p348_p1 = scmp.lt.s32.totalorder %s224_s7, %s224_s7 }
   0xe   :  { %306 = vmatpush3.bf16.msra.mxu1 %v303_v20  ;;  %p344_p0 = scmp.ne.s32.totalorder %s224_s7, %s343_s8  ;;  %p349_p2 = scmp.lt.s32.totalorder %s343_s8, %s343_s8 }
   0xf   :  { %308 = vmatprep.subr.bf16.mxu1 %v307_v23 }
  0x10   :  { %235 = vmatmul.mubr.msk.f32.gmra.mrb[2].mxu0 %vm25_vm0, %v16_v14  ;;  %p350_p3 = por %p349_p2, %p348_p1 }
  0x12   :  { %310 = vmatpush3.bf16.msra.mxu1 %v307_v23  ;;  %p351_p4 = pnand %p350_p3, %p344_p0 }
  0x13   :  { %312 = vmatprep.subr.bf16.mxu1 %v311_v26 }
  0x16   :  { %314 = vmatpush3.bf16.msra.mxu1 %v311_v26 }
  0x17   :  { %316 = vmatprep.subr.bf16.mxu1 %v315_v29 }
  0x1a   :  { %318 = vmatpush3.bf16.msra.mxu1 %v315_v29 }
  0x1b   :  { %320 = vmatprep.subr.bf16.mxu1 %v319_v32 }
  0x1e   :  { %322 = vmatpush3.bf16.msra.mxu1 %v319_v32 }
  0x1f   :  { %324 = vmatprep.subr.bf16.mxu1 %v323_v35 }
  0x22   :  { %326 = vmatpush3.bf16.msra.mxu1 %v323_v35 }
  0x23   :  { %328 = vmatprep.subr.bf16.mxu1 %v327_v38 }
  0x26   :  { %330 = vmatpush3.bf16.msra.mxu1 %v327_v38 }
  0xdf   :  { %v98_v39 = vpop.f32.mrb[0].mxu0 }
  0xe0   :  { %v236_v40 = vmul.f32 -1.442695, %v98_v39  ;;  %v100_v41 = vpop.f32.mrb[1].mxu0 }
  0xe2   :  { %335 = vpow2.f32 %v236_v40 }
  0xe3   :  { %v104_v42 = vpop.f32.mrb[2].mxu0 }
  0xe4   :  { %v237_v43 = vmul.f32 -1.442695, %v104_v42  ;;  %v106_v44 = vpop.f32.mrb[3].mxu0 }
  0xe6   :  { %337 = vpow2.f32 %v237_v43 }
  0xec   :  { %v336_v45 = vpop.eup %335 }
  0xed   :  { %v115_v46 = vadd.f32 1.0, %v336_v45 }
  0xef   :  { %339 = vrcp.f32 %v115_v46 }
  0xf0   :  { %v338_v47 = vpop.eup %337 }
  0xf1   :  { %v116_v48 = vadd.f32 1.0, %v338_v47 }
  0xf3   :  { %341 = vrcp.f32 %v116_v48 }
  0xf9   :  { %v340_v49 = vpop.eup %339 }
  0xfa   :  { %v121_v50 = vmul.f32 %v340_v49, %v98_v39 }
  0xfc   :  { %v123_v51 = vadd.f32 %v121_v50, %v100_v41 }
  0xfd   :  { %v342_v52 = vpop.eup %341 }
  0xfe   :  { %v122_v53 = vmul.f32 %v342_v52, %v104_v42  ;;  %288 = vmatprep.mubr.f32.mxu1 %v123_v51 }
 0x100   :  { %v124_v54 = vadd.f32 %v122_v53, %v106_v44 }
 0x102   :  { %289 = vmatmul.mubr.f32.vlgmr.msra.gmra.mrb[0].mxu1 %v124_v54 }
 0x1d5   :  { %v290_v55 = vpop.f32.mrb[0].mxu1 }
 0x1d6   :  { %217 = vst.msk [vmem:[#allocation2 + $0x8] sm:$0xff] %vm25_vm0, %v290_v55  ;;  %v207_v56 = vpop.f32.mrb[1].mxu1 }
 0x1d7   :  { %216 = vst.msk [vmem:[#allocation2] sm:$0xff] %vm25_vm0, %v207_v56 }
 0x1d8   :  { %354 = shalt.err (!%p351_p4)
}
 0x1d9   :  { %s355_s11 = scalar_lea.hbm %s488_s3, 256 }
 0x1da   :  { %p356_p5 = scmp.ne.s32.totalorder %s488_s3, %s355_s11  ;;  %p359_p6 = scmp.lt.u32.totalorder %s355_s11, %s488_s3 }
 0x1dc   :  { %p361_p7 = pnand %p359_p6, %p356_p5 }
 0x1de   :  { %364 = shalt.err (!%p361_p7)
}
 0x1df   :  { %s369_s15 = smov 128   ;;  %s370_s16 = smov 8  }
 0x1e0   :  { %229 = dma.vmem_to_hbm [thread:$0]  %s224_s7, 256, %s488_s3, [#allocation3], %s369_s15, %s369_s15, %s370_s16  }
 0x1e1   :  { %365 = dma.done.wait [#allocation3], 256  }
 0x1e2   :  { %366 = vsyncadd [#allocation3], 4294967040 }
 0x1e3   :  { %233 = vsyncpa [#allocation3], 1 }

</bundles_post_ra>
